<compile_context>
chip_gen: v6e
topology: v6e:2x2x1
jax: 0.10.0
libtpu: 0.0.40
codegen_flags: <defaults>
</compile_context>

<pallas_src>
import math

import jax
import jax.numpy as jnp
from jax.experimental import pallas as pl
from jax.experimental.pallas import tpu as pltpu


def _make_kernel(batch, seq_len, num_heads, head_dims, model_dims):
    scale = 1.0 / math.sqrt(head_dims)
    bs = batch * seq_len

    def kernel(tok_ref, emb_ref, wqkv_ref, wout_ref, bout_ref, o_ref):
        # tok_ref:  (B*S, 1)        int32 token ids (whole batch)
        # emb_ref:  (T_pad, M)      bf16 embedding table (rows >= T are zero)
        # wqkv_ref: (M, 3M)         bf16, W_qkv^T, columns ordered [q | k | v]
        # wout_ref: (M, T_pad)      bf16, W_out^T padded on the vocab axis
        # bout_ref: (1, T_pad)      f32 output bias (zero padded)
        # o_ref:    (B*S, T_pad)    f32 logits (lane-dense padded vocab)
        t_pad = emb_ref.shape[0]

        # ---- embedding lookup: exact one-hot gather on the MXU (bf16) ----
        tok = tok_ref[...]                                              # (BS, 1)
        vocab_ids = jax.lax.broadcasted_iota(jnp.int32, (bs, t_pad), 1)  # (BS, T_pad)
        onehot = (vocab_ids == tok).astype(jnp.bfloat16)                # (BS, T_pad)
        z = jnp.dot(onehot, emb_ref[...],
                    preferred_element_type=jnp.float32)                 # (BS, M)
        z = z.astype(jnp.bfloat16)

        # ---- fused qkv projection: ONE 2-D matmul (BS, M) @ (M, 3M) ----
        proj = jnp.dot(z, wqkv_ref[...],
                       preferred_element_type=jnp.float32)              # (BS, 3M)
        proj = proj.astype(jnp.bfloat16)

        # ---- split q/k/v + heads: lane slices + leading-axis stack ----
        def split_heads(block):                     # (BS, M) -> (H*B, S, Dh)
            parts = [
                block[:, h * head_dims:(h + 1) * head_dims]
                .reshape(batch, seq_len, head_dims)
                for h in range(num_heads)
            ]
            return jnp.stack(parts, axis=0).reshape(
                num_heads * batch, seq_len, head_dims)

        q = split_heads(proj[:, :model_dims])
        k = split_heads(proj[:, model_dims:2 * model_dims])
        v = split_heads(proj[:, 2 * model_dims:])

        # ---- causal attention over all (head, batch) pairs at once ----
        s = jnp.einsum('gqd,gkd->gqk', q, k,
                       preferred_element_type=jnp.float32) * scale      # (H*B, S, S)
        row = jax.lax.broadcasted_iota(jnp.int32, (seq_len, seq_len), 0)
        col = jax.lax.broadcasted_iota(jnp.int32, (seq_len, seq_len), 1)
        mask = jnp.where(col <= row, 0.0, -1e30).astype(jnp.float32)    # (S, S)
        s = s + mask[None]
        s = s - jnp.max(s, axis=-1, keepdims=True)
        p = jnp.exp(s)
        p = p * pl.reciprocal(jnp.sum(p, axis=-1, keepdims=True), approx=True)
        attn = jnp.einsum('gqk,gkd->gqd', p.astype(jnp.bfloat16), v,
                          preferred_element_type=jnp.float32)           # (H*B, S, Dh)
        attn = attn.astype(jnp.bfloat16).reshape(
            num_heads, batch, seq_len, head_dims)

        # ---- merge heads (lane concat) + output projection: ONE matmul ----
        merged = jnp.concatenate(
            [attn[h].reshape(bs, head_dims) for h in range(num_heads)],
            axis=-1)                                                    # (BS, M)
        logits = jnp.dot(merged, wout_ref[...],
                         preferred_element_type=jnp.float32)            # (BS, T_pad)
        logits = logits + bout_ref[...]
        o_ref[...] = logits.astype(o_ref.dtype)

    return kernel


def prepare_params(params, *, num_heads, lane=128):
    """One-time layout prep (done at init, NOT per forward call)."""
    emb = params["embedding"]          # (T, M)  f32
    w_qkv = params["w_qkv"]            # (3M, M) PyTorch layout, rows [q;k;v]
    w_out = params["w_out"]            # (T, M)  PyTorch layout
    b_out = params["b_out"]            # (T,)
    num_tokens, model_dims = emb.shape
    t_pad = ((num_tokens + lane - 1) // lane) * lane

    emb_p = jnp.zeros((t_pad, model_dims), jnp.bfloat16)
    emb_p = emb_p.at[:num_tokens].set(emb.astype(jnp.bfloat16))

    # y = z @ W_qkv^T  ->  keep W_qkv^T = (M, 3M), columns ordered [q | k | v].
    wqkv_t = jnp.asarray(w_qkv).T.astype(jnp.bfloat16)

    # logits = v_hat @ W_out^T + b  ->  keep W_out^T = (M, T) padded to (M, T_pad).
    wout_t = jnp.zeros((model_dims, t_pad), jnp.bfloat16)
    wout_t = wout_t.at[:, :num_tokens].set(jnp.asarray(w_out).T.astype(jnp.bfloat16))

    bout_p = jnp.zeros((1, t_pad), jnp.float32)
    bout_p = bout_p.at[0, :num_tokens].set(b_out.astype(jnp.float32))

    return {
        "emb": emb_p, "wqkv": wqkv_t, "wout": wout_t, "bout": bout_p,
        "num_tokens": num_tokens, "t_pad": t_pad,
        "num_heads": num_heads, "model_dims": model_dims,
    }


def test_model_forward(x_tokens, prep):
    """x_tokens: (B, S) int token ids; prep: output of prepare_params."""
    batch, seq_len = x_tokens.shape
    t_pad = prep["t_pad"]
    model_dims = prep["model_dims"]
    num_heads = prep["num_heads"]
    head_dims = model_dims // num_heads
    num_tokens = prep["num_tokens"]
    bs = batch * seq_len

    tok2 = x_tokens.astype(jnp.int32).reshape(bs, 1)

    flops = (2 * bs * t_pad * model_dims                         # one-hot gather
             + 2 * bs * model_dims * 3 * model_dims              # qkv projection
             + 4 * batch * num_heads * seq_len * seq_len * head_dims  # qk^T + pv
             + 2 * bs * model_dims * t_pad)                      # output projection
    cost = pl.CostEstimate(
        flops=flops,
        transcendentals=batch * num_heads * seq_len * seq_len,
        bytes_accessed=(tok2.size * 4 + prep["emb"].size * 2
                        + prep["wqkv"].size * 2 + prep["wout"].size * 2
                        + prep["bout"].size * 4 + bs * t_pad * 4),
    )

    kernel = _make_kernel(batch, seq_len, num_heads, head_dims, model_dims)

    out = pl.pallas_call(
        kernel,
        out_shape=jax.ShapeDtypeStruct((bs, t_pad), jnp.float32),
        grid=(1,),
        in_specs=[
            pl.BlockSpec((bs, 1), lambda i: (0, 0)),
            pl.BlockSpec((t_pad, model_dims), lambda i: (0, 0)),
            pl.BlockSpec((model_dims, 3 * model_dims), lambda i: (0, 0)),
            pl.BlockSpec((model_dims, t_pad), lambda i: (0, 0)),
            pl.BlockSpec((1, t_pad), lambda i: (0, 0)),
        ],
        out_specs=pl.BlockSpec((bs, t_pad), lambda i: (0, 0)),
        compiler_params=pltpu.CompilerParams(
            dimension_semantics=("arbitrary",)),
        cost_estimate=cost,
    )(tok2, prep["emb"], prep["wqkv"], prep["wout"], prep["bout"])

    return out.reshape(batch, seq_len, t_pad)[..., :num_tokens]


def init_params(key, num_tokens, model_dims):
    k1, k2, k3, k4 = jax.random.split(key, 4)
    emb = jax.random.normal(k1, (num_tokens, model_dims), jnp.float32)
    lim = 1.0 / math.sqrt(model_dims)
    w_qkv = jax.random.uniform(k2, (3 * model_dims, model_dims), jnp.float32,
                               -lim, lim)
    w_out = jax.random.uniform(k3, (num_tokens, model_dims), jnp.float32,
                               -lim, lim)
    b_out = jax.random.uniform(k4, (num_tokens,), jnp.float32, -lim, lim)
    return {"embedding": emb, "w_qkv": w_qkv, "w_out": w_out, "b_out": b_out}


if __name__ == "__main__":
    num_tokens = 64
    model_dims = 32
    num_heads = 4
    batch, seq_len = 2, 8

    key = jax.random.PRNGKey(0)
    kp, kx = jax.random.split(key)
    params = init_params(kp, num_tokens, model_dims)
    prep = prepare_params(params, num_heads=num_heads)   # one-time layout prep
    x = jax.random.randint(kx, (batch, seq_len), 0, num_tokens, dtype=jnp.int32)

    logits = test_model_forward(x, prep)
    jax.block_until_ready(logits)
    assert logits.shape == (batch, seq_len, num_tokens)
    assert bool(jnp.all(jnp.isfinite(logits)))
    print("KERNEL_OK")
</pallas_src>

<mosaic_0001>
module attributes {stable_mosaic.version = 11 : i64} {
  func.func @kernel(%arg0: i32, %arg1: memref<16x1xi32, #tpu.memory_space<vmem>>, %arg2: memref<128x32xbf16, #tpu.memory_space<vmem>>, %arg3: memref<32x96xbf16, #tpu.memory_space<vmem>>, %arg4: memref<32x128xbf16, #tpu.memory_space<vmem>>, %arg5: memref<1x128xf32, #tpu.memory_space<vmem>>, %arg6: memref<16x128xf32, #tpu.memory_space<vmem>>) attributes {dimension_semantics = [#tpu.dimension_semantics<arbitrary>], iteration_bounds = array<i64: 1>, scalar_prefetch = 0 : i64, scratch_operands = 0 : i64, tpu.core_type = #tpu.core_type<tc>, window_params = [{pipeline_mode = #tpu.pipeline_mode<synchronous>, transform_indices = @transform_0, window_bounds = array<i64: 16, 1>}, {pipeline_mode = #tpu.pipeline_mode<synchronous>, transform_indices = @transform_1, window_bounds = array<i64: 128, 32>}, {pipeline_mode = #tpu.pipeline_mode<synchronous>, transform_indices = @transform_2, window_bounds = array<i64: 32, 96>}, {pipeline_mode = #tpu.pipeline_mode<synchronous>, transform_indices = @transform_3, window_bounds = array<i64: 32, 128>}, {pipeline_mode = #tpu.pipeline_mode<synchronous>, transform_indices = @transform_4, window_bounds = array<i64: 1, 128>}, {pipeline_mode = #tpu.pipeline_mode<synchronous>, transform_indices = @transform_5, window_bounds = array<i64: 16, 128>}]} {
    %c0 = arith.constant 0 : index
    %c0_0 = arith.constant 0 : index
    %0 = vector.load %arg1[%c0, %c0_0] : memref<16x1xi32, #tpu.memory_space<vmem>>, vector<16x1xi32>
    %1 = tpu.iota {dimensions = array<i32: 1>} : vector<16x128xi32>
    %2 = vector.broadcast %0 : vector<16x1xi32> to vector<16x128xi32>
    %3 = arith.cmpi eq, %1, %2 : vector<16x128xi32>
    %4 = arith.extui %3 : vector<16x128xi1> to vector<16x128xi32>
    %5 = arith.sitofp %4 : vector<16x128xi32> to vector<16x128xf32>
    %6 = arith.truncf %5 : vector<16x128xf32> to vector<16x128xbf16>
    %c0_1 = arith.constant 0 : index
    %c0_2 = arith.constant 0 : index
    %7 = vector.load %arg2[%c0_1, %c0_2] : memref<128x32xbf16, #tpu.memory_space<vmem>>, vector<128x32xbf16>
    %cst = arith.constant dense<0.000000e+00> : vector<16x32xf32>
    %8 = tpu.matmul %6, %7, %cst {dimension_numbers = #tpu.dot_dimension_numbers<[1], [0], [0], [1], [0, 0, 1, 1], [], []>} : vector<16x128xbf16>, vector<128x32xbf16>, vector<16x32xf32> -> vector<16x32xf32>
    %9 = arith.truncf %8 : vector<16x32xf32> to vector<16x32xbf16>
    %c0_3 = arith.constant 0 : index
    %c0_4 = arith.constant 0 : index
    %10 = vector.load %arg3[%c0_3, %c0_4] : memref<32x96xbf16, #tpu.memory_space<vmem>>, vector<32x96xbf16>
    %cst_5 = arith.constant dense<0.000000e+00> : vector<16x96xf32>
    %11 = tpu.matmul %9, %10, %cst_5 {dimension_numbers = #tpu.dot_dimension_numbers<[1], [0], [0], [1], [0, 0, 1, 1], [], []>} : vector<16x32xbf16>, vector<32x96xbf16>, vector<16x96xf32> -> vector<16x96xf32>
    %12 = arith.truncf %11 : vector<16x96xf32> to vector<16x96xbf16>
    %13 = vector.extract_strided_slice %12 {offsets = [0, 0], sizes = [16, 32], strides = [1, 1]} : vector<16x96xbf16> to vector<16x32xbf16>
    %14 = vector.extract_strided_slice %13 {offsets = [0, 0], sizes = [16, 8], strides = [1, 1]} : vector<16x32xbf16> to vector<16x8xbf16>
    %15 = vector.shape_cast %14 : vector<16x8xbf16> to vector<2x8x8xbf16>
    %16 = vector.extract_strided_slice %13 {offsets = [0, 8], sizes = [16, 8], strides = [1, 1]} : vector<16x32xbf16> to vector<16x8xbf16>
    %17 = vector.shape_cast %16 : vector<16x8xbf16> to vector<2x8x8xbf16>
    %18 = vector.extract_strided_slice %13 {offsets = [0, 16], sizes = [16, 8], strides = [1, 1]} : vector<16x32xbf16> to vector<16x8xbf16>
    %19 = vector.shape_cast %18 : vector<16x8xbf16> to vector<2x8x8xbf16>
    %20 = vector.extract_strided_slice %13 {offsets = [0, 24], sizes = [16, 8], strides = [1, 1]} : vector<16x32xbf16> to vector<16x8xbf16>
    %21 = vector.shape_cast %20 : vector<16x8xbf16> to vector<2x8x8xbf16>
    %22 = vector.shape_cast %15 : vector<2x8x8xbf16> to vector<1x2x8x8xbf16>
    %23 = vector.shape_cast %17 : vector<2x8x8xbf16> to vector<1x2x8x8xbf16>
    %24 = vector.shape_cast %19 : vector<2x8x8xbf16> to vector<1x2x8x8xbf16>
    %25 = vector.shape_cast %21 : vector<2x8x8xbf16> to vector<1x2x8x8xbf16>
    %26 = tpu.concatenate %22, %23, %24, %25 in 0 : vector<1x2x8x8xbf16>, vector<1x2x8x8xbf16>, vector<1x2x8x8xbf16>, vector<1x2x8x8xbf16> -> vector<4x2x8x8xbf16>
    %27 = vector.shape_cast %26 : vector<4x2x8x8xbf16> to vector<8x8x8xbf16>
    %28 = vector.extract_strided_slice %12 {offsets = [0, 32], sizes = [16, 32], strides = [1, 1]} : vector<16x96xbf16> to vector<16x32xbf16>
    %29 = vector.extract_strided_slice %28 {offsets = [0, 0], sizes = [16, 8], strides = [1, 1]} : vector<16x32xbf16> to vector<16x8xbf16>
    %30 = vector.shape_cast %29 : vector<16x8xbf16> to vector<2x8x8xbf16>
    %31 = vector.extract_strided_slice %28 {offsets = [0, 8], sizes = [16, 8], strides = [1, 1]} : vector<16x32xbf16> to vector<16x8xbf16>
    %32 = vector.shape_cast %31 : vector<16x8xbf16> to vector<2x8x8xbf16>
    %33 = vector.extract_strided_slice %28 {offsets = [0, 16], sizes = [16, 8], strides = [1, 1]} : vector<16x32xbf16> to vector<16x8xbf16>
    %34 = vector.shape_cast %33 : vector<16x8xbf16> to vector<2x8x8xbf16>
    %35 = vector.extract_strided_slice %28 {offsets = [0, 24], sizes = [16, 8], strides = [1, 1]} : vector<16x32xbf16> to vector<16x8xbf16>
    %36 = vector.shape_cast %35 : vector<16x8xbf16> to vector<2x8x8xbf16>
    %37 = vector.shape_cast %30 : vector<2x8x8xbf16> to vector<1x2x8x8xbf16>
    %38 = vector.shape_cast %32 : vector<2x8x8xbf16> to vector<1x2x8x8xbf16>
    %39 = vector.shape_cast %34 : vector<2x8x8xbf16> to vector<1x2x8x8xbf16>
    %40 = vector.shape_cast %36 : vector<2x8x8xbf16> to vector<1x2x8x8xbf16>
    %41 = tpu.concatenate %37, %38, %39, %40 in 0 : vector<1x2x8x8xbf16>, vector<1x2x8x8xbf16>, vector<1x2x8x8xbf16>, vector<1x2x8x8xbf16> -> vector<4x2x8x8xbf16>
    %42 = vector.shape_cast %41 : vector<4x2x8x8xbf16> to vector<8x8x8xbf16>
    %43 = vector.extract_strided_slice %12 {offsets = [0, 64], sizes = [16, 32], strides = [1, 1]} : vector<16x96xbf16> to vector<16x32xbf16>
    %44 = vector.extract_strided_slice %43 {offsets = [0, 0], sizes = [16, 8], strides = [1, 1]} : vector<16x32xbf16> to vector<16x8xbf16>
    %45 = vector.shape_cast %44 : vector<16x8xbf16> to vector<2x8x8xbf16>
    %46 = vector.extract_strided_slice %43 {offsets = [0, 8], sizes = [16, 8], strides = [1, 1]} : vector<16x32xbf16> to vector<16x8xbf16>
    %47 = vector.shape_cast %46 : vector<16x8xbf16> to vector<2x8x8xbf16>
    %48 = vector.extract_strided_slice %43 {offsets = [0, 16], sizes = [16, 8], strides = [1, 1]} : vector<16x32xbf16> to vector<16x8xbf16>
    %49 = vector.shape_cast %48 : vector<16x8xbf16> to vector<2x8x8xbf16>
    %50 = vector.extract_strided_slice %43 {offsets = [0, 24], sizes = [16, 8], strides = [1, 1]} : vector<16x32xbf16> to vector<16x8xbf16>
    %51 = vector.shape_cast %50 : vector<16x8xbf16> to vector<2x8x8xbf16>
    %52 = vector.shape_cast %45 : vector<2x8x8xbf16> to vector<1x2x8x8xbf16>
    %53 = vector.shape_cast %47 : vector<2x8x8xbf16> to vector<1x2x8x8xbf16>
    %54 = vector.shape_cast %49 : vector<2x8x8xbf16> to vector<1x2x8x8xbf16>
    %55 = vector.shape_cast %51 : vector<2x8x8xbf16> to vector<1x2x8x8xbf16>
    %56 = tpu.concatenate %52, %53, %54, %55 in 0 : vector<1x2x8x8xbf16>, vector<1x2x8x8xbf16>, vector<1x2x8x8xbf16>, vector<1x2x8x8xbf16> -> vector<4x2x8x8xbf16>
    %57 = vector.shape_cast %56 : vector<4x2x8x8xbf16> to vector<8x8x8xbf16>
    "tpu.trace_start"() <{level = 10 : i32, message = "gqd,gkd->gqk"}> : () -> ()
    %cst_6 = arith.constant dense<0.000000e+00> : vector<8x8x8xf32>
    %58 = tpu.matmul %27, %42, %cst_6 {dimension_numbers = #tpu.dot_dimension_numbers<[2], [2], [1], [1], [0, 0, 0, 1, 1, 1], [0], [0]>} : vector<8x8x8xbf16>, vector<8x8x8xbf16>, vector<8x8x8xf32> -> vector<8x8x8xf32>
    "tpu.trace_stop"() : () -> ()
    %cst_7 = arith.constant 0.353553385 : f32
    %59 = vector.broadcast %cst_7 : f32 to vector<8x8x8xf32>
    %60 = arith.mulf %58, %59 : vector<8x8x8xf32>
    %61 = tpu.iota {dimensions = array<i32: 0>} : vector<8x8xi32>
    %62 = tpu.iota {dimensions = array<i32: 1>} : vector<8x8xi32>
    %63 = arith.cmpi sle, %62, %61 : vector<8x8xi32>
    %cst_8 = arith.constant 0.000000e+00 : f32
    %cst_9 = arith.constant -1.000000e+30 : f32
    %64 = vector.broadcast %cst_8 : f32 to vector<8x8xf32>
    %65 = vector.broadcast %cst_9 : f32 to vector<8x8xf32>
    %66 = arith.select %63, %64, %65 : vector<8x8xi1>, vector<8x8xf32>
    %67 = vector.shape_cast %66 : vector<8x8xf32> to vector<1x8x8xf32>
    %68 = vector.broadcast %67 : vector<1x8x8xf32> to vector<8x8x8xf32>
    %69 = arith.addf %60, %68 : vector<8x8x8xf32>
    %cst_10 = arith.constant dense<0xFF800000> : vector<8x8xf32>
    %70 = vector.multi_reduction <maximumf>, %69, %cst_10 [2] : vector<8x8x8xf32> to vector<8x8xf32>
    %71 = vector.shape_cast %70 : vector<8x8xf32> to vector<8x8x1xf32>
    %72 = vector.broadcast %71 : vector<8x8x1xf32> to vector<8x8x8xf32>
    %73 = arith.subf %69, %72 : vector<8x8x8xf32>
    %74 = math.exp %73 : vector<8x8x8xf32>
    %cst_11 = arith.constant dense<0.000000e+00> : vector<8x8xf32>
    %75 = vector.multi_reduction <add>, %74, %cst_11 [2] : vector<8x8x8xf32> to vector<8x8xf32>
    %76 = vector.shape_cast %75 : vector<8x8xf32> to vector<8x8x1xf32>
    %77 = tpu.reciprocal %76 {approx = true} : vector<8x8x1xf32> -> vector<8x8x1xf32>
    %78 = vector.broadcast %77 : vector<8x8x1xf32> to vector<8x8x8xf32>
    %79 = arith.mulf %74, %78 : vector<8x8x8xf32>
    %80 = arith.truncf %79 : vector<8x8x8xf32> to vector<8x8x8xbf16>
    "tpu.trace_start"() <{level = 10 : i32, message = "gqk,gkd->gqd"}> : () -> ()
    %cst_12 = arith.constant dense<0.000000e+00> : vector<8x8x8xf32>
    %81 = tpu.matmul %80, %57, %cst_12 {dimension_numbers = #tpu.dot_dimension_numbers<[2], [1], [1], [2], [0, 0, 0, 1, 1, 2], [0], [0]>} : vector<8x8x8xbf16>, vector<8x8x8xbf16>, vector<8x8x8xf32> -> vector<8x8x8xf32>
    "tpu.trace_stop"() : () -> ()
    %82 = arith.truncf %81 : vector<8x8x8xf32> to vector<8x8x8xbf16>
    %83 = vector.shape_cast %82 : vector<8x8x8xbf16> to vector<4x2x8x8xbf16>
    %84 = vector.extract_strided_slice %83 {offsets = [0, 0, 0, 0], sizes = [1, 2, 8, 8], strides = [1, 1, 1, 1]} : vector<4x2x8x8xbf16> to vector<1x2x8x8xbf16>
    %85 = vector.shape_cast %84 : vector<1x2x8x8xbf16> to vector<2x8x8xbf16>
    %86 = vector.shape_cast %85 : vector<2x8x8xbf16> to vector<16x8xbf16>
    %87 = vector.extract_strided_slice %83 {offsets = [1, 0, 0, 0], sizes = [1, 2, 8, 8], strides = [1, 1, 1, 1]} : vector<4x2x8x8xbf16> to vector<1x2x8x8xbf16>
    %88 = vector.shape_cast %87 : vector<1x2x8x8xbf16> to vector<2x8x8xbf16>
    %89 = vector.shape_cast %88 : vector<2x8x8xbf16> to vector<16x8xbf16>
    %90 = vector.extract_strided_slice %83 {offsets = [2, 0, 0, 0], sizes = [1, 2, 8, 8], strides = [1, 1, 1, 1]} : vector<4x2x8x8xbf16> to vector<1x2x8x8xbf16>
    %91 = vector.shape_cast %90 : vector<1x2x8x8xbf16> to vector<2x8x8xbf16>
    %92 = vector.shape_cast %91 : vector<2x8x8xbf16> to vector<16x8xbf16>
    %93 = vector.extract_strided_slice %83 {offsets = [3, 0, 0, 0], sizes = [1, 2, 8, 8], strides = [1, 1, 1, 1]} : vector<4x2x8x8xbf16> to vector<1x2x8x8xbf16>
    %94 = vector.shape_cast %93 : vector<1x2x8x8xbf16> to vector<2x8x8xbf16>
    %95 = vector.shape_cast %94 : vector<2x8x8xbf16> to vector<16x8xbf16>
    %96 = tpu.concatenate %86, %89, %92, %95 in 1 : vector<16x8xbf16>, vector<16x8xbf16>, vector<16x8xbf16>, vector<16x8xbf16> -> vector<16x32xbf16>
    %c0_13 = arith.constant 0 : index
    %c0_14 = arith.constant 0 : index
    %97 = vector.load %arg4[%c0_13, %c0_14] : memref<32x128xbf16, #tpu.memory_space<vmem>>, vector<32x128xbf16>
    %cst_15 = arith.constant dense<0.000000e+00> : vector<16x128xf32>
    %98 = tpu.matmul %96, %97, %cst_15 {dimension_numbers = #tpu.dot_dimension_numbers<[1], [0], [0], [1], [0, 0, 1, 1], [], []>} : vector<16x32xbf16>, vector<32x128xbf16>, vector<16x128xf32> -> vector<16x128xf32>
    %c0_16 = arith.constant 0 : index
    %c0_17 = arith.constant 0 : index
    %99 = vector.load %arg5[%c0_16, %c0_17] : memref<1x128xf32, #tpu.memory_space<vmem>>, vector<1x128xf32>
    %100 = vector.broadcast %99 : vector<1x128xf32> to vector<16x128xf32>
    %101 = arith.addf %98, %100 : vector<16x128xf32>
    %c0_18 = arith.constant 0 : index
    %c0_19 = arith.constant 0 : index
    %102 = vector.load %arg6[%c0_18, %c0_19] : memref<16x128xf32, #tpu.memory_space<vmem>>, vector<16x128xf32>
    tpu.vector_store %arg6[%c0_18, %c0_19], %101 {strides = array<i32>} : memref<16x128xf32, #tpu.memory_space<vmem>>, vector<16x128xf32>,
    return
  }
  func.func @transform_0(%arg0: i32) -> (i32, i32) {
    %c0_i32 = arith.constant 0 : i32
    %c0_i32_0 = arith.constant 0 : i32
    %c0_i32_1 = arith.constant 0 : i32
    return %c0_i32, %c0_i32_0 : i32, i32
  }
  func.func @transform_1(%arg0: i32) -> (i32, i32) {
    %c0_i32 = arith.constant 0 : i32
    %c0_i32_0 = arith.constant 0 : i32
    %c0_i32_1 = arith.constant 0 : i32
    return %c0_i32, %c0_i32_0 : i32, i32
  }
  func.func @transform_2(%arg0: i32) -> (i32, i32) {
    %c0_i32 = arith.constant 0 : i32
    %c0_i32_0 = arith.constant 0 : i32
    %c0_i32_1 = arith.constant 0 : i32
    return %c0_i32, %c0_i32_0 : i32, i32
  }
  func.func @transform_3(%arg0: i32) -> (i32, i32) {
    %c0_i32 = arith.constant 0 : i32
    %c0_i32_0 = arith.constant 0 : i32
    %c0_i32_1 = arith.constant 0 : i32
    return %c0_i32, %c0_i32_0 : i32, i32
  }
  func.func @transform_4(%arg0: i32) -> (i32, i32) {
    %c0_i32 = arith.constant 0 : i32
    %c0_i32_0 = arith.constant 0 : i32
    %c0_i32_1 = arith.constant 0 : i32
    return %c0_i32, %c0_i32_0 : i32, i32
  }
  func.func @transform_5(%arg0: i32) -> (i32, i32) {
    %c0_i32 = arith.constant 0 : i32
    %c0_i32_0 = arith.constant 0 : i32
    %c0_i32_1 = arith.constant 0 : i32
    return %c0_i32, %c0_i32_0 : i32, i32
  }
}

</mosaic_0001>

<bundles_post_ra>
// kernel: tpu_custom_call.1
= control target key start
LH: loop header
LB: loop body
LE: loop exit
PB: predicated region body
PF: predicated region fallthrough
CT: control target
= control target key end

     0   :  { %v1563_v1 = vmov 0   ;;  %v1564_v2 = vmov 0.0   ;;  %vm1565_vm0 = vmmov 0   ;;  %s1867_s0 = inlined_call_operand.vmem [shape: s32[16,1], index: 0, kind: input, shape index: {}]   ;;  %s1868_s1 = inlined_call_operand.vmem [shape: bf16[128,32], index: 1, kind: input, shape index: {}]   ;;  %s1869_s2 = inlined_call_operand.vmem [shape: bf16[32,96], index: 2, kind: input, shape index: {}]   ;;  %s1870_s3 = inlined_call_operand.vmem [shape: bf16[32,128], index: 3, kind: input, shape index: {}]   ;;  %s1871_s4 = inlined_call_operand.vmem [shape: f32[1,128], index: 4, kind: input, shape index: {}]   ;;  %s1872_s5 = inlined_call_operand.hbm [shape: f32[16,128], index: 5, kind: output, shape index: {}]  }
   0x1   :  { %v22_v0 = vld [vmem:[%s1867_s0] sm:$0xff]  ;;  %1496 = vset.pattern.permute.xlu0 %v1563_v1  ;;  %1349 = vmatprep.subr.bf16.mxu0 %v1564_v2  ;;  %v1497_v3 = vld [vmem:[%s1868_s1 + $0x38] sm:$0xff]   ;;  %v23_v4 = vld [vmem:[%s1867_s0 + $0x8] sm:$0xff] }
   0x2   :  { %27 = vperm.xlu0 %1496, %v22_v0   ;;  %1369 = vmatprep.subr.bf16.mxu1 %v1564_v2  ;;  %v1498_v5 = vld [vmem:[%s1868_s1 + $0x30] sm:$0xff]   ;;  %v1499_v6 = vld [vmem:[%s1868_s1 + $0x28] sm:$0xff]   ;;  %v1500_v7 = vld [vmem:[%s1868_s1 + $0x20] sm:$0xff]  }
   0x3   :  { %1350 = vmatpush3.bf16.msra.mxu0 %v1497_v3  ;;  %1365 = vmatprep.mubr.msk.bf16.mxu0 %vm1565_vm0, %v1564_v2 }
   0x4   :  { %1351 = vmatprep.subr.bf16.mxu0 %v1564_v2  ;;  %1373 = vmatprep.mubr.msk.bf16.mxu1 %vm1565_vm0, %v1564_v2 }
   0x6   :  { %30 = vperm.xlu0 %1496, %v23_v4  }
   0x7   :  { %1352 = vmatpush3.bf16.msra.mxu0 %v1498_v5 }
   0x8   :  { %1353 = vmatprep.subr.bf16.mxu0 %v1564_v2 }
   0xb   :  { %1354 = vmatpush3.bf16.msra.mxu0 %v1499_v6 }
   0xc   :  { %1355 = vmatprep.subr.bf16.mxu0 %v1564_v2 }
   0xd   :  { %10 = vsyncpa [#allocation3], 0  ;;  %v1501_v8 = vld [vmem:[%s1868_s1 + $0x18] sm:$0xff]   ;;  %v1502_v9 = vld [vmem:[%s1868_s1 + $0x10] sm:$0xff]   ;;  %v24_v12 = vlaneseq  ;;  %v1566_v16 = vmov 1.0|1.0  }
   0xe   :  { %v1503_v10 = vld [vmem:[%s1868_s1 + $0x8] sm:$0xff]   ;;  %v1504_v11 = vld [vmem:[%s1868_s1] sm:$0xff]   ;;  %vm161_vm4 = vcmask 261120   ;;  %s1567_s15 = smov 112   ;;  %s1569_s16 = smov 104   ;;  %vm226_vm5 = vcmask 64512  }
   0xf   :  { %1356 = vmatpush3.bf16.msra.mxu0 %v1500_v7  ;;  %v1653_v14 = vand.u32 127, %v24_v12  ;;  %v1505_v17 = vld [vmem:[%s1869_s2 + $0x8] sm:$0xff]   ;;  %v1506_v18 = vld [vmem:[%s1869_s2] sm:$0xff]   ;;  %s1568_s2 = smov 120   ;;  %s1570_s17 = smov 96   ;;  %vm742_vm6 = vcmask 1043456  }
  0x10   :  { %1357 = vmatprep.subr.bf16.mxu0 %v1564_v2  ;;  %1370 = vmatpush3.bf16.msra.mxu1 %v1505_v17  ;;  %s1571_s18 = smov 64   ;;  %v630_v60 = vshrl.u32 %v24_v12, 7  ;;  %v1572_v61 = vmov -1e+30   ;;  %s1573_s19 = smov 8   ;;  %vm1159_vm8 = vcmask 130048  }
  0x11   :  { %1371 = vmatprep.subr.bf16.mxu1 %v1564_v2  ;;  %s1574_s24 = smov 16   ;;  %vm1162_vm9 = vcmask 195584   ;;  %s1576_s0 = smov [#allocation2]  }
  0x12   :  { %vm631_vm7 = vcmp.le.s32.totalorder %v1653_v14, %v630_v60  ;;  %s1238_s27 = sshll.u32 %s1576_s0, 4  ;;  %s1239_s27 = int_to_ptr.vmem [resolvable:$true] %s1238_s27 }
  0x13   :  { %1358 = vmatpush3.bf16.msra.mxu0 %v1501_v8  ;;  %v632_v62 = vsel %vm631_vm7, 0.0, %v1572_v61  ;;  %s1541_s28 = scalar_lea.vmem %s1239_s27, 256  ;;  %p1546_p1 = scmp.lt.s32.totalorder %s1239_s27, %s1239_s27 }
  0x14   :  { %1359 = vmatprep.subr.bf16.mxu0 %v1564_v2  ;;  %1372 = vmatpush3.bf16.msra.mxu1 %v1506_v18  ;;  %p1542_p0 = scmp.ne.s32.totalorder %s1239_s27, %s1541_s28  ;;  %p1547_p2 = scmp.lt.s32.totalorder %s1541_s28, %s1541_s28 }
  0x15   :  { %1377 = vmatprep.subr.bf16.mxu1 %v1564_v2 }
  0x16   :  { %p1548_p3 = por %p1547_p2, %p1546_p1 }
  0x17   :  { %1360 = vmatpush3.bf16.msra.mxu0 %v1502_v9 }
  0x18   :  { %1361 = vmatprep.subr.bf16.mxu0 %v1564_v2  ;;  %p1549_p4 = pnand %p1548_p3, %p1542_p0 }
  0x1b   :  { %1362 = vmatpush3.bf16.msra.mxu0 %v1503_v10 }
  0x1c   :  { %1363 = vmatprep.subr.bf16.mxu0 %v1564_v2 }
  0x1f   :  { %1364 = vmatpush3.bf16.msra.mxu0 %v1504_v11 }
  0x20   :  { %1395 = vmatprep.subr.bf16.mxu0 %v1564_v2 }
  0x7d   :  { %v28_v13 = vpop.permute.xlu0 %27 }
  0x7e   :  { %vm32_vm1 = vcmp.eq.s32.totalorder %v1653_v14, %v28_v13 }
  0x81   :  { %v31_v15 = vpop.permute.xlu0 %30 }
  0x82   :  { %vm33_vm2 = vcmp.eq.s32.totalorder %v1653_v14, %v31_v15 }
  0x83   :  { %vm1259_vm3 = vmpackc.low %vm33_vm2, %vm32_vm1 }
  0x84   :  { %1366 = vmatmul.mubr.msk.bf16.vlgmr.msra.gmra.mxu0 %vm1259_vm3, %v1566_v16 }
  0x85   :  { %1397 = vmatprep.mubr.msk.bf16.mxu0 %vm1565_vm0, %v1564_v2 }
 0x144   :  { %v137_v19 = vpop.f32.mrf.mxu0 }
 0x146   :  { %v1367_v20 = vpop.f32.mrf.mxu0 }
 0x148   :  { %v140_v21 = vpop.f32.mrf.mxu0 }
 0x149   :  { %v144_v22 = vpack.c.bf16 %v140_v21, %v137_v19 }
 0x14a   :  { %v1368_v23 = vpop.f32.mrf.mxu0 }
 0x14b   :  { %1374 = vmatmul.mubr.msk.bf16.vlgmr.msra.gmra.mxu1 %vm161_vm4, %v144_v22 }
 0x14c   :  { %1379 = vmatprep.mubr.msk.bf16.mxu1 %vm1565_vm0, %v1564_v2 }
 0x20b   :  { %v199_v24 = vpop.f32.mrf.mxu1 }
 0x20c   :  { %v1296_v25 = vpack.c.bf16 %v199_v24, %v199_v24 }
 0x20d   :  { %v1375_v26 = vpop.f32.mrf.mxu1 }
 0x20e   :  { %216 = vrot.lane.b32.xlu0 %v1296_v25, %s1567_s15  ;;  %212 = vrot.lane.b32.xlu1 %v1296_v25, %s1568_s2 }
 0x20f   :  { %v202_v27 = vpop.f32.mrf.mxu1 }
 0x210   :  { %v1670_v28 = vpack.c.bf16 %v202_v27, %v202_v27 }
 0x211   :  { %v1376_v29 = vpop.f32.mrf.mxu1 }
 0x212   :  { %220 = vrot.lane.b32.xlu0 %v1296_v25, %s1569_s16  ;;  %214 = vrot.lane.b32.xlu1 %v1670_v28, %s1568_s2 }
 0x216   :  { %224 = vrot.lane.b32.xlu0 %v1296_v25, %s1570_s17  ;;  %218 = vrot.lane.b32.xlu1 %v1670_v28, %s1567_s15 }
 0x21a   :  { %222 = vrot.lane.b32.xlu1 %v1670_v28, %s1569_s16 }
 0x21e   :  { %273 = vrot.lane.b32.xlu1 %v1670_v28, %s1570_s17 }
 0x280   :  { %v217_v30 = vpop.permute.xlu0 %216  ;;  %v213_v31 = vpop.permute.xlu1 %212 }
 0x281   :  { %v1676_v32 = vcombine.low %v213_v31, %v213_v31  ;;  %v1681_v35 = vcombine.low %v217_v30, %v217_v30 }
 0x283   :  { %323 = vrot.lane.b32.xlu0 %v1676_v32, %s1570_s17 }
 0x284   :  { %v1679_v33 = vpop.permute.xlu0 %220  ;;  %v215_v34 = vpop.permute.xlu1 %214 }
 0x285   :  { %v1683_v36 = vcombine.low %v215_v34, %v215_v34  ;;  %v1689_v39 = vcombine.low %v1679_v33, %v1679_v33 }
 0x287   :  { %423 = vrot.lane.b32.xlu0 %v1681_v35, %s1570_s17  ;;  %373 = vrot.lane.b32.xlu1 %v1683_v36, %s1570_s17 }
 0x288   :  { %v225_v37 = vpop.permute.xlu0 %224  ;;  %v219_v38 = vpop.permute.xlu1 %218 }
 0x289   :  { %v231_v40 = vsel %vm226_vm5, %v225_v37, 0  ;;  %v1692_v41 = vcombine.low %v219_v38, %v219_v38 }
 0x28a   :  { %1378 = vmatpush3.bf16.xpose.msra.mxu1 %v231_v40 }
 0x28b   :  { %523 = vrot.lane.b32.xlu0 %v1689_v39, %s1570_s17  ;;  %473 = vrot.lane.b32.xlu1 %v1692_v41, %s1570_s17 }
 0x28c   :  { %v223_v42 = vpop.permute.xlu1 %222  ;;  %1383 = vmatprep.subr.bf16.mxu1 %v1564_v2 }
 0x28d   :  { %v1697_v43 = vcombine.low %v223_v42, %v223_v42 }
 0x28f   :  { %573 = vrot.lane.b32.xlu1 %v1697_v43, %s1570_s17 }
 0x290   :  { %v274_v44 = vpop.permute.xlu1 %273 }
 0x291   :  { %v279_v45 = vsel %vm226_vm5, %v274_v44, 0  ;;  %1380 = vmatmul.mubr.msk.bf16.vlgmr.msra.gmra.mxu1 %vm226_vm5, %v1296_v25 }
 0x292   :  { %1384 = vmatpush3.bf16.xpose.msra.mxu1 %v279_v45  ;;  %1385 = vmatprep.mubr.msk.bf16.mxu1 %vm1565_vm0, %v1564_v2 }
 0x293   :  { %737 = vrot.lane.b32.xlu1 %v1296_v25, %s1571_s18  ;;  %1389 = vmatprep.subr.bf16.mxu1 %v1564_v2 }
 0x299   :  { %1386 = vmatmul.mubr.msk.bf16.vlgmr.msra.gmra.mxu1 %vm226_vm5, %v1670_v28 }
 0x29a   :  { %1391 = vmatprep.mubr.msk.bf16.mxu1 %vm1565_vm0, %v1564_v2 }
 0x2f5   :  { %v324_v46 = vpop.permute.xlu0 %323 }
 0x2f6   :  { %v329_v47 = vsel %vm226_vm5, %v324_v46, 0 }
 0x2f7   :  { %1390 = vmatpush3.bf16.xpose.msra.mxu1 %v329_v47 }
 0x2f8   :  { %1401 = vmatprep.subr.bf16.mxu1 %v1564_v2 }
 0x2f9   :  { %v374_v48 = vpop.permute.xlu1 %373  ;;  %v424_v50 = vpop.permute.xlu0 %423 }
 0x2fa   :  { %v379_v49 = vsel %vm226_vm5, %v374_v48, 0  ;;  %v429_v51 = vsel %vm226_vm5, %v424_v50, 0 }
 0x2fb   :  { %1396 = vmatpush3.bf16.xpose.msra.mxu0 %v379_v49 }
 0x2fc   :  { %1407 = vmatprep.subr.bf16.mxu0 %v1564_v2 }
 0x2fd   :  { %v474_v52 = vpop.permute.xlu1 %473  ;;  %v524_v54 = vpop.permute.xlu0 %523 }
 0x2fe   :  { %1392 = vmatmul.mubr.msk.bf16.vlgmr.msra.gmra.mxu1 %vm226_vm5, %v213_v31  ;;  %v479_v53 = vsel %vm226_vm5, %v474_v52, 0  ;;  %v529_v56 = vsel %vm226_vm5, %v524_v54, 0 }
 0x2ff   :  { %1402 = vmatpush3.bf16.xpose.msra.mxu1 %v429_v51  ;;  %1403 = vmatprep.mubr.msk.bf16.mxu1 %vm1565_vm0, %v1564_v2 }
 0x300   :  { %1413 = vmatprep.subr.bf16.mxu1 %v1564_v2 }
 0x301   :  { %v574_v55 = vpop.permute.xlu1 %573 }
 0x302   :  { %1398 = vmatmul.mubr.msk.bf16.vlgmr.msra.gmra.mxu0 %vm226_vm5, %v215_v34  ;;  %v579_v57 = vsel %vm226_vm5, %v574_v55, 0 }
 0x303   :  { %1408 = vmatpush3.bf16.xpose.msra.mxu0 %v479_v53  ;;  %1409 = vmatprep.mubr.msk.bf16.mxu0 %vm1565_vm0, %v1564_v2 }
 0x304   :  { %1419 = vmatprep.subr.bf16.mxu0 %v1564_v2 }
 0x305   :  { %v738_v58 = vpop.permute.xlu1 %737 }
 0x306   :  { %1404 = vmatmul.mubr.msk.bf16.vlgmr.msra.gmra.mxu1 %vm226_vm5, %v217_v30  ;;  %v744_v59 = vsel %vm742_vm6, %v738_v58, 0 }
 0x307   :  { %1414 = vmatpush3.bf16.xpose.msra.mxu1 %v529_v56  ;;  %1415 = vmatprep.mubr.msk.bf16.mxu1 %vm1565_vm0, %v1564_v2 }
 0x308   :  { %1425 = vmatprep.subr.bf16.mxu1 %v1564_v2 }
 0x30a   :  { %1410 = vmatmul.mubr.msk.bf16.vlgmr.msra.gmra.mxu0 %vm226_vm5, %v219_v38 }
 0x30b   :  { %1420 = vmatpush3.bf16.xpose.msra.mxu0 %v579_v57  ;;  %1421 = vmatprep.mubr.msk.bf16.mxu0 %vm1565_vm0, %v1564_v2 }
 0x30c   :  { %1431 = vmatprep.subr.bf16.mxu0 %v1564_v2 }
 0x30e   :  { %1416 = vmatmul.mubr.msk.bf16.vlgmr.msra.gmra.mxu1 %vm226_vm5, %v1679_v33 }
 0x30f   :  { %1426 = vmatpush3.bf16.msra.mxu1 %v744_v59  ;;  %1427 = vmatprep.mubr.msk.bf16.mxu1 %vm1565_vm0, %v1564_v2 }
 0x310   :  { %1437 = vmatprep.subr.bf16.mxu1 %v1564_v2 }
 0x312   :  { %1422 = vmatmul.mubr.msk.bf16.vlgmr.msra.gmra.mxu0 %vm226_vm5, %v223_v42 }
 0x313   :  { %1433 = vmatprep.mubr.msk.bf16.mxu0 %vm1565_vm0, %v1564_v2 }
 0x351   :  { %v267_v63 = vpop.f32.mrf.mxu1 }
 0x352   :  { %v621_v0 = vmul.f32 0.35355338, %v267_v63 }
 0x353   :  { %v1381_v1 = vpop.f32.mrf.mxu1 }
 0x354   :  { %v1745_v3 = vadd.f32 %v632_v62, %v621_v0 }
 0x355   :  { %v270_v4 = vpop.f32.mrf.mxu1 }
 0x356   :  { %v641_v5 = vsel %vm226_vm5, %v1745_v3, -inf }
 0x357   :  { %642 = vmax.xlane.f32.xlu0 %v641_v5  ;;  %v1382_v6 = vpop.f32.mrf.mxu1 }
 0x359   :  { %v315_v7 = vpop.f32.mrf.mxu1 }
 0x35a   :  { %v622_v8 = vmul.f32 0.35355338, %v315_v7 }
 0x35b   :  { %v1387_v9 = vpop.f32.mrf.mxu1 }
 0x35c   :  { %v634_v10 = vadd.f32 %v632_v62, %v622_v8 }
 0x35d   :  { %v318_v11 = vpop.f32.mrf.mxu1 }
 0x35e   :  { %v644_v12 = vsel %vm226_vm5, %v634_v10, -inf }
 0x35f   :  { %645 = vmax.xlane.f32.xlu1 %v644_v12  ;;  %v1388_v13 = vpop.f32.mrf.mxu1 }
 0x3be   :  { %v365_v14 = vpop.f32.mrf.mxu1 }
 0x3bf   :  { %v623_v15 = vmul.f32 0.35355338, %v365_v14 }
 0x3c0   :  { %v1393_v16 = vpop.f32.mrf.mxu1 }
 0x3c1   :  { %v1750_v17 = vadd.f32 %v632_v62, %v623_v15 }
 0x3c2   :  { %v368_v18 = vpop.f32.mrf.mxu1  ;;  %v415_v19 = vpop.f32.mrf.mxu0 }
 0x3c3   :  { %v624_v20 = vmul.f32 0.35355338, %v415_v19  ;;  %v647_v21 = vsel %vm226_vm5, %v1750_v17, -inf }
 0x3c4   :  { %648 = vmax.xlane.f32.xlu0 %v647_v21  ;;  %v1394_v22 = vpop.f32.mrf.mxu1  ;;  %v1399_v23 = vpop.f32.mrf.mxu0 }
 0x3c5   :  { %v636_v24 = vadd.f32 %v632_v62, %v624_v20 }
 0x3c6   :  { %v418_v25 = vpop.f32.mrf.mxu0  ;;  %v465_v26 = vpop.f32.mrf.mxu1 }
 0x3c7   :  { %v625_v27 = vmul.f32 0.35355338, %v465_v26  ;;  %v650_v29 = vsel %vm226_vm5, %v636_v24, -inf }
 0x3c8   :  { %v1405_v30 = vpop.f32.mrf.mxu1  ;;  %651 = vmax.xlane.f32.xlu0 %v650_v29  ;;  %v1400_v31 = vpop.f32.mrf.mxu0 }
 0x3c9   :  { %v1755_v33 = vadd.f32 %v632_v62, %v625_v27 }
 0x3ca   :  { %v468_v34 = vpop.f32.mrf.mxu1  ;;  %v515_v37 = vpop.f32.mrf.mxu0 }
 0x3cb   :  { %v626_v38 = vmul.f32 0.35355338, %v515_v37  ;;  %v653_v40 = vsel %vm226_vm5, %v1755_v33, -inf }
 0x3cc   :  { %654 = vmax.xlane.f32.xlu1 %v653_v40  ;;  %v1406_v42 = vpop.f32.mrf.mxu1  ;;  %v1411_v44 = vpop.f32.mrf.mxu0 }
 0x3cd   :  { %v1759_v45 = vadd.f32 %v632_v62, %v626_v38 }
 0x3ce   :  { %v518_v46 = vpop.f32.mrf.mxu0  ;;  %v565_v47 = vpop.f32.mrf.mxu1 }
 0x3cf   :  { %v627_v48 = vmul.f32 0.35355338, %v565_v47  ;;  %v656_v49 = vsel %vm226_vm5, %v1759_v45, -inf }
 0x3d0   :  { %v1417_v50 = vpop.f32.mrf.mxu1  ;;  %657 = vmax.xlane.f32.xlu0 %v656_v49  ;;  %v1412_v51 = vpop.f32.mrf.mxu0 }
 0x3d1   :  { %v639_v52 = vadd.f32 %v632_v62, %v627_v48 }
 0x3d2   :  { %v568_v53 = vpop.f32.mrf.mxu1  ;;  %v615_v54 = vpop.f32.mrf.mxu0 }
 0x3d3   :  { %v628_v55 = vmul.f32 0.35355338, %v615_v54  ;;  %v659_v56 = vsel %vm226_vm5, %v639_v52, -inf }
 0x3d4   :  { %660 = vmax.xlane.f32.xlu1 %v659_v56  ;;  %v1418_v57 = vpop.f32.mrf.mxu1  ;;  %v1423_v58 = vpop.f32.mrf.mxu0 }
 0x3d5   :  { %v640_v59 = vadd.f32 %v632_v62, %v628_v55 }
 0x3d6   :  { %v618_v60 = vpop.f32.mrf.mxu0 }
 0x3d7   :  { %v662_v61 = vsel %vm226_vm5, %v640_v59, -inf }
 0x3d8   :  { %663 = vmax.xlane.f32.xlu0 %v662_v61  ;;  %v1424_v63 = vpop.f32.mrf.mxu0 }
 0x3e0   :  { %v643_v0 = vpop.xlane.xlu0 %642 }
 0x3e1   :  { %v665_v4 = vsub.f32 %v1745_v3, %v643_v0 }
 0x3e3   :  { %v673_v62 = vmul.f32 1.442695, %v665_v4 }
 0x3e5   :  { %834 = vrot.lane.b32.xlu1 %v1676_v32, %s1571_s18  ;;  %1509 = vpow2.f32 %v673_v62 }
 0x3e8   :  { %v646_v1 = vpop.xlane.xlu1 %645 }
 0x3e9   :  { %882 = vrot.lane.b32.xlu1 %v1683_v36, %s1571_s18  ;;  %v666_v5 = vsub.f32 %v634_v10, %v646_v1 }
 0x3eb   :  { %v675_v6 = vmul.f32 1.442695, %v666_v5 }
 0x3ed   :  { %1511 = vpow2.f32 %v675_v6 }
 0x3ee   :  { %786 = vrot.lane.b32.xlu0 %v1670_v28, %s1571_s18 }
 0x3f2   :  { %v1510_v7 = vpop.eup %1509 }
 0x3f3   :  { %v689_v9 = vsel %vm226_vm5, %v1510_v7, 0.0 }
 0x3fa   :  { %v1512_v8 = vpop.eup %1511 }
 0x3fb   :  { %v692_v32 = vsel %vm226_vm5, %v1512_v8, 0.0 }
 0x40d   :  { %690 = vadd.xlane.f32.xlu1 %v689_v9  ;;  %693 = vadd.xlane.f32.xlu0 %v692_v32 }
 0x44d   :  { %v649_v36 = vpop.xlane.xlu0 %648 }
 0x44e   :  { %v667_v28 = vsub.f32 %v1750_v17, %v649_v36 }
 0x450   :  { %v677_v11 = vmul.f32 1.442695, %v667_v28 }
 0x451   :  { %v652_v12 = vpop.xlane.xlu0 %651 }
 0x452   :  { %1513 = vpow2.f32 %v677_v11  ;;  %v668_v3 = vsub.f32 %v636_v24, %v652_v12 }
 0x454   :  { %v679_v10 = vmul.f32 1.442695, %v668_v3 }
 0x455   :  { %v655_v21 = vpop.xlane.xlu1 %654 }
 0x456   :  { %1515 = vpow2.f32 %v679_v10  ;;  %v669_v22 = vsub.f32 %v1755_v33, %v655_v21 }
 0x458   :  { %v681_v25 = vmul.f32 1.442695, %v669_v22 }
 0x459   :  { %v658_v13 = vpop.xlane.xlu0 %657 }
 0x45a   :  { %v670_v24 = vsub.f32 %v1759_v45, %v658_v13  ;;  %1517 = vpow2.f32 %v681_v25 }
 0x45c   :  { %v683_v27 = vmul.f32 1.442695, %v670_v24 }
 0x45d   :  { %v661_v23 = vpop.xlane.xlu1 %660 }
 0x45e   :  { %v671_v26 = vsub.f32 %v639_v52, %v661_v23  ;;  %1519 = vpow2.f32 %v683_v27 }
 0x45f   :  { %v1775_v14 = vpop.eup %1513 }
 0x460   :  { %v695_v15 = vsel %vm226_vm5, %v1775_v14, 0.0  ;;  %v685_v29 = vmul.f32 1.442695, %v671_v26 }
 0x461   :  { %696 = vadd.xlane.f32.xlu1 %v695_v15  ;;  %v664_v16 = vpop.xlane.xlu0 %663  ;;  %v835_v34 = vpop.permute.xlu1 %834 }
 0x462   :  { %v672_v30 = vsub.f32 %v640_v59, %v664_v16  ;;  %1521 = vpow2.f32 %v685_v29  ;;  %v840_v54 = vsel %vm742_vm6, %v835_v34, 0 }
 0x463   :  { %v1779_v18 = vpop.eup %1515 }
 0x464   :  { %v698_v19 = vsel %vm226_vm5, %v1779_v18, 0.0  ;;  %v687_v31 = vmul.f32 1.442695, %v672_v30 }
 0x465   :  { %699 = vadd.xlane.f32.xlu0 %v698_v19  ;;  %v787_v17 = vpop.permute.xlu0 %786  ;;  %v883_v37 = vpop.permute.xlu1 %882 }
 0x466   :  { %v792_v20 = vsel %vm742_vm6, %v787_v17, 0  ;;  %1523 = vpow2.f32 %v687_v31  ;;  %v888_v55 = vsel %vm742_vm6, %v883_v37, 0 }
 0x467   :  { %1432 = vmatpush3.bf16.msra.mxu0 %v792_v20 }
 0x468   :  { %1443 = vmatprep.subr.bf16.mxu0 %v1564_v2 }
 0x472   :  { %978 = vrot.lane.b32.xlu1 %v1692_v41, %s1571_s18  ;;  %v1791_v41 = vpop.eup %1517 }
 0x473   :  { %v701_v33 = vsel %vm226_vm5, %v1791_v41, 0.0 }
 0x47b   :  { %930 = vrot.lane.b32.xlu0 %v1681_v35, %s1571_s18  ;;  %v1793_v35 = vpop.eup %1519 }
 0x47c   :  { %v1797_v38 = vpop.eup %1521  ;;  %v704_v45 = vsel %vm226_vm5, %v1793_v35, 0.0 }
 0x47d   :  { %v707_v44 = vsel %vm226_vm5, %v1797_v38, 0.0  ;;  %v1803_v46 = vpop.eup %1523 }
 0x47e   :  { %v710_v47 = vsel %vm226_vm5, %v1803_v46, 0.0 }
 0x496   :  { %702 = vadd.xlane.f32.xlu1 %v701_v33  ;;  %v691_v40 = vpop.xlane.xlu1 %690  ;;  %v694_v42 = vpop.xlane.xlu0 %693 }
 0x497   :  { %1525 = vrcp.f32 %v691_v40 }
 0x498   :  { %1527 = vrcp.f32 %v694_v42  ;;  %v1507_v42 = vld [vmem:[%s1870_s3 + $0x8] sm:$0xff]  }
 0x49a   :  { %708 = vadd.xlane.f32.xlu1 %v707_v44  ;;  %705 = vadd.xlane.f32.xlu0 %v704_v45  ;;  %v1508_v44 = vld [vmem:[%s1870_s3] sm:$0xff]   ;;  %s1575_s3 = smov 24  }
 0x49e   :  { %711 = vadd.xlane.f32.xlu0 %v710_v47 }
 0x4a4   :  { %v1526_v48 = vpop.eup %1525 }
 0x4a5   :  { %v1528_v49 = vpop.eup %1527  ;;  %v721_v50 = vmul.f32 %v1526_v48, %v1510_v7 }
 0x4a6   :  { %v722_v51 = vmul.f32 %v1528_v49, %v1512_v8 }
 0x4a7   :  { %v729_v52 = vpack.c.bf16 %v721_v50, %v721_v50 }
 0x4a8   :  { %v730_v53 = vpack.c.bf16 %v722_v51, %v722_v51 }
 0x4a9   :  { %1428 = vmatmul.mubr.msk.bf16.vlgmr.msra.gmra.mxu1 %vm226_vm5, %v729_v52 }
 0x4aa   :  { %1434 = vmatmul.mubr.msk.bf16.vlgmr.msra.gmra.mxu0 %vm226_vm5, %v730_v53  ;;  %1438 = vmatpush3.bf16.msra.mxu1 %v840_v54 }
 0x4ab   :  { %1444 = vmatpush3.bf16.msra.mxu0 %v888_v55  ;;  %1074 = vrot.lane.b32.xlu1 %v1697_v43, %s1571_s18 }
 0x4ac   :  { %1439 = vmatprep.mubr.msk.bf16.mxu1 %vm1565_vm0, %v1564_v2  ;;  %1449 = vmatprep.subr.bf16.mxu1 %v1564_v2 }
 0x4ad   :  { %1445 = vmatprep.mubr.msk.bf16.mxu0 %vm1565_vm0, %v1564_v2  ;;  %1455 = vmatprep.subr.bf16.mxu0 %v1564_v2 }
 0x4b4   :  { %1026 = vrot.lane.b32.xlu0 %v1689_v39, %s1571_s18 }
 0x4ea   :  { %v697_v56 = vpop.xlane.xlu1 %696 }
 0x4eb   :  { %1529 = vrcp.f32 %v697_v56 }
 0x4ee   :  { %v700_v57 = vpop.xlane.xlu0 %699  ;;  %v979_v1 = vpop.permute.xlu1 %978 }
 0x4ef   :  { %1531 = vrcp.f32 %v700_v57  ;;  %v984_v4 = vsel %vm742_vm6, %v979_v1, 0 }
 0x4f2   :  { %v931_v59 = vpop.permute.xlu0 %930 }
 0x4f3   :  { %v936_v63 = vsel %vm742_vm6, %v931_v59, 0 }
 0x4f8   :  { %v1530_v58 = vpop.eup %1529 }
 0x4f9   :  { %v723_v43 = vmul.f32 %v1530_v58, %v1775_v14 }
 0x4fb   :  { %v731_v60 = vpack.c.bf16 %v723_v43, %v723_v43 }
 0x4fc   :  { %v1532_v61 = vpop.eup %1531 }
 0x4fd   :  { %1440 = vmatmul.mubr.msk.bf16.vlgmr.msra.gmra.mxu1 %vm226_vm5, %v731_v60  ;;  %v724_v0 = vmul.f32 %v1532_v61, %v1779_v18 }
 0x4fe   :  { %1450 = vmatpush3.bf16.msra.mxu1 %v936_v63  ;;  %1451 = vmatprep.mubr.msk.bf16.mxu1 %vm1565_vm0, %v1564_v2 }
 0x4ff   :  { %v732_v39 = vpack.c.bf16 %v724_v0, %v724_v0  ;;  %1461 = vmatprep.subr.bf16.mxu1 %v1564_v2 }
 0x501   :  { %1446 = vmatmul.mubr.msk.bf16.vlgmr.msra.gmra.mxu0 %vm226_vm5, %v732_v39 }
 0x502   :  { %1456 = vmatpush3.bf16.msra.mxu0 %v984_v4  ;;  %1457 = vmatprep.mubr.msk.bf16.mxu0 %vm1565_vm0, %v1564_v2 }
 0x503   :  { %1467 = vmatprep.subr.bf16.mxu0 %v1564_v2 }
 0x51f   :  { %v703_v5 = vpop.xlane.xlu1 %702 }
 0x520   :  { %1533 = vrcp.f32 %v703_v5  ;;  %v1292_v5 = vld [vmem:[%s1871_s4] ss:$0 sm:$0xff] }
 0x523   :  { %v709_v62 = vpop.xlane.xlu1 %708  ;;  %v706_v6 = vpop.xlane.xlu0 %705 }
 0x524   :  { %1535 = vrcp.f32 %v709_v62 }
 0x525   :  { %1537 = vrcp.f32 %v706_v6 }
 0x527   :  { %v712_v7 = vpop.xlane.xlu0 %711  ;;  %v1075_v10 = vpop.permute.xlu1 %1074 }
 0x528   :  { %1539 = vrcp.f32 %v712_v7  ;;  %v1080_v16 = vsel %vm742_vm6, %v1075_v10, 0 }
 0x52b   :  { %v1027_v32 = vpop.permute.xlu0 %1026 }
 0x52c   :  { %v1032_v12 = vsel %vm742_vm6, %v1027_v32, 0 }
 0x52d   :  { %v1534_v8 = vpop.eup %1533 }
 0x52e   :  { %v725_v9 = vmul.f32 %v1534_v8, %v1791_v41 }
 0x530   :  { %v733_v36 = vpack.c.bf16 %v725_v9, %v725_v9 }
 0x531   :  { %v1536_v28 = vpop.eup %1535 }
 0x532   :  { %v1538_v11 = vpop.eup %1537  ;;  %1452 = vmatmul.mubr.msk.bf16.vlgmr.msra.gmra.mxu1 %vm226_vm5, %v733_v36  ;;  %v727_v13 = vmul.f32 %v1536_v28, %v1797_v38 }
 0x533   :  { %1462 = vmatpush3.bf16.msra.mxu1 %v1032_v12  ;;  %v726_v3 = vmul.f32 %v1538_v11, %v1793_v35  ;;  %1463 = vmatprep.mubr.msk.bf16.mxu1 %vm1565_vm0, %v1564_v2 }
 0x534   :  { %1473 = vmatprep.subr.bf16.mxu1 %v1564_v2  ;;  %v735_v18 = vpack.c.bf16 %v727_v13, %v727_v13 }
 0x535   :  { %v734_v14 = vpack.c.bf16 %v726_v3, %v726_v3  ;;  %v1540_v15 = vpop.eup %1539 }
 0x536   :  { %v728_v19 = vmul.f32 %v1540_v15, %v1803_v46 }
 0x537   :  { %1458 = vmatmul.mubr.msk.bf16.vlgmr.msra.gmra.mxu0 %vm226_vm5, %v734_v14 }
 0x538   :  { %1468 = vmatpush3.bf16.msra.mxu0 %v1080_v16  ;;  %1469 = vmatprep.mubr.msk.bf16.mxu0 %vm1565_vm0, %v1564_v2  ;;  %v736_v17 = vpack.c.bf16 %v728_v19, %v728_v19 }
 0x53a   :  { %1464 = vmatmul.mubr.msk.bf16.vlgmr.msra.gmra.mxu1 %vm226_vm5, %v735_v18 }
 0x53b   :  { %1477 = vmatprep.mubr.msk.bf16.mxu1 %vm1565_vm0, %v1564_v2  ;;  %1474 = vmatpush3.bf16.msra.mxu1 %v1507_v42 }
 0x53c   :  { %1475 = vmatprep.subr.bf16.mxu1 %v1564_v2 }
 0x53f   :  { %1470 = vmatmul.mubr.msk.bf16.vlgmr.msra.gmra.mxu0 %vm226_vm5, %v736_v17  ;;  %1476 = vmatpush3.bf16.msra.mxu1 %v1508_v44 }
 0x569   :  { %v780_v20 = vpop.f32.mrf.mxu1 }
 0x56a   :  { %v828_v21 = vpop.f32.mrf.mxu0 }
 0x56b   :  { %v1298_v22 = vpack.c.bf16 %v828_v21, %v780_v20  ;;  %v1429_v23 = vpop.f32.mrf.mxu1 }
 0x56c   :  { %v1435_v24 = vpop.f32.mrf.mxu0 }
 0x56d   :  { %v783_v25 = vpop.f32.mrf.mxu1 }
 0x56e   :  { %v831_v26 = vpop.f32.mrf.mxu0 }
 0x56f   :  { %v1430_v27 = vpop.f32.mrf.mxu1 }
 0x570   :  { %v1436_v29 = vpop.f32.mrf.mxu0 }
 0x5bd   :  { %v876_v30 = vpop.f32.mrf.mxu1 }
 0x5bf   :  { %v1441_v31 = vpop.f32.mrf.mxu1 }
 0x5c1   :  { %v879_v34 = vpop.f32.mrf.mxu1  ;;  %v924_v41 = vpop.f32.mrf.mxu0 }
 0x5c2   :  { %v1299_v37 = vpack.c.bf16 %v924_v41, %v876_v30 }
 0x5c3   :  { %v1442_v35 = vpop.f32.mrf.mxu1  ;;  %v1447_v33 = vpop.f32.mrf.mxu0 }
 0x5c4   :  { %1140 = vrot.lane.b32.xlu0 %v1299_v37, %s1573_s19 }
 0x5c5   :  { %v927_v38 = vpop.f32.mrf.mxu0 }
 0x5c7   :  { %v1448_v40 = vpop.f32.mrf.mxu0 }
 0x5f2   :  { %v972_v45 = vpop.f32.mrf.mxu1 }
 0x5f4   :  { %v1453_v46 = vpop.f32.mrf.mxu1 }
 0x5f6   :  { %v975_v47 = vpop.f32.mrf.mxu1 }
 0x5f7   :  { %v1020_v48 = vpop.f32.mrf.mxu0 }
 0x5f8   :  { %v1300_v49 = vpack.c.bf16 %v1020_v48, %v972_v45  ;;  %v1454_v50 = vpop.f32.mrf.mxu1 }
 0x5f9   :  { %v1459_v51 = vpop.f32.mrf.mxu0 }
 0x5fa   :  { %1147 = vrot.lane.b32.xlu1 %v1300_v49, %s1574_s24  ;;  %v1068_v52 = vpop.f32.mrf.mxu1 }
 0x5fb   :  { %v1023_v53 = vpop.f32.mrf.mxu0 }
 0x5fc   :  { %v1465_v54 = vpop.f32.mrf.mxu1 }
 0x5fd   :  { %v1460_v55 = vpop.f32.mrf.mxu0 }
 0x5fe   :  { %v1071_v56 = vpop.f32.mrf.mxu1 }
 0x5ff   :  { %v1116_v57 = vpop.f32.mrf.mxu0 }
 0x600   :  { %v1301_v58 = vpack.c.bf16 %v1116_v57, %v1068_v52  ;;  %v1466_v43 = vpop.f32.mrf.mxu1 }
 0x601   :  { %v1471_v59 = vpop.f32.mrf.mxu0 }
 0x602   :  { %1154 = vrot.lane.b32.xlu0 %v1301_v58, %s1575_s3 }
 0x603   :  { %v1119_v2 = vpop.f32.mrf.mxu0 }
 0x605   :  { %v1472_v60 = vpop.f32.mrf.mxu0 }
 0x636   :  { %v1141_v61 = vpop.permute.xlu0 %1140 }
 0x637   :  { %v1158_v0 = vsel %vm226_vm5, %v1298_v22, %v1141_v61 }
 0x66c   :  { %v1148_v63 = vpop.permute.xlu1 %1147 }
 0x66d   :  { %v1161_v1 = vsel %vm1159_vm8, %v1158_v0, %v1148_v63 }
 0x674   :  { %v1155_v39 = vpop.permute.xlu0 %1154 }
 0x675   :  { %v1164_v4 = vsel %vm1162_vm9, %v1161_v1, %v1155_v39 }
 0x676   :  { %1478 = vmatmul.mubr.msk.bf16.vlgmr.msra.gmra.mxu1 %vm161_vm4, %v1164_v4 }
 0x736   :  { %v1224_v62 = vpop.f32.mrf.mxu1 }
 0x737   :  { %v1225_v6 = vadd.f32 %v1292_v5, %v1224_v62 }
 0x738   :  { %v1479_v7 = vpop.f32.mrf.mxu1 }
 0x739   :  { %1231 = vst [vmem:[#allocation2] sm:$0xff] %v1225_v6 }
 0x73a   :  { %v1227_v8 = vpop.f32.mrf.mxu1 }
 0x73b   :  { %v1228_v9 = vadd.f32 %v1292_v5, %v1227_v8 }
 0x73c   :  { %v1480_v32 = vpop.f32.mrf.mxu1 }
 0x73d   :  { %1232 = vst [vmem:[#allocation2 + $0x8] sm:$0xff] %v1228_v9 }
 0x73e   :  { %1552 = shalt.err (!%p1549_p4)
}
 0x73f   :  { %s1577_s29 = smov 128  }
 0x740   :  { %1244 = dma.vmem_to_hbm [thread:$0]  %s1239_s27, 256, %s1872_s5, [#allocation3], %s1577_s29, %s1577_s29, %s1573_s19  }
 0x741   :  { %1561 = dma.done.wait [#allocation3], 256  }
 0x742   :  { %1562 = vsyncadd [#allocation3], 4294967040 }
 0x743   :  { %1248 = vsyncpa [#allocation3], 1 }

</bundles_post_ra>
